<compile_context>
chip_gen: v7x
topology: tpu7x:2x2x1
jax: 0.10.0
libtpu: 0.0.40
codegen_flags: <defaults>
</compile_context>

<pallas_src>
import functools

import jax
import jax.numpy as jnp
from jax.experimental import pallas as pl
from jax.experimental.pallas import tpu as pltpu


def _layernorm_kernel(x_ref, w_ref, b_ref, o_ref, *, eps, chunk, n_chunks):
    # x_ref / o_ref: (TILE_ROWS, H); w_ref / b_ref: (1, H).
    # Load + upcast gamma/beta once per grid step (hoisted out of the loop).
    w = w_ref[...].astype(jnp.float32)
    b = b_ref[...].astype(jnp.float32)

    def body(i, carry):
        r = pl.multiple_of(i * chunk, chunk)
        x = x_ref[pl.ds(r, chunk), :].astype(jnp.float32)
        u = jnp.mean(x, axis=-1, keepdims=True)          # mean over hidden
        xc = x - u
        s = jnp.mean(xc * xc, axis=-1, keepdims=True)    # biased variance
        inv = jax.lax.rsqrt(s + eps)                      # 1/sqrt(var+eps), EUP
        o_ref[pl.ds(r, chunk), :] = (w * (xc * inv) + b).astype(o_ref.dtype)
        return carry

    if n_chunks == 1:
        body(0, 0)
    else:
        jax.lax.fori_loop(0, n_chunks, body, 0, unroll=(n_chunks <= 8))


def _sublane_granularity(itemsize):
    # Minimum second-to-last tile dim per dtype packing.
    return {4: 8, 2: 16, 1: 32}.get(itemsize, 8)


def _round_up(x, m):
    return ((x + m - 1) // m) * m


def _round_down(x, m):
    return (x // m) * m


def _vmem_capacity_bytes():
    """Physical VMEM per TensorCore; conservative 64 MiB (v7x) fallback."""
    try:
        info = pltpu.get_tpu_info()
        for name in ("vmem_capacity_bytes", "vmem_bytes", "vmem_size_bytes"):
            cap = getattr(info, name, None)
            if cap:
                return int(cap)
    except Exception:
        pass
    return 64 * 1024 * 1024


def _pick_tiling(rows, hidden, itemsize, vmem_limit):
    """Return (tile_rows, chunk_rows).

    tile_rows: BlockSpec row tile (big, DMA-efficient, VMEM-budgeted).
    chunk_rows: in-kernel strip-mine width that bounds fp32 intermediates.
    tile_rows is always a multiple of chunk_rows; chunk_rows a multiple of the
    dtype sublane granularity.
    """
    gran = _sublane_granularity(itemsize)
    rows_r = _round_up(rows, gran)

    # Chunk: bound the fp32 working set (~3 fp32 arrays of (chunk, hidden):
    # x, xc, scaled result) to <= ~1/4 of the VMEM limit.
    chunk_cap = max(gran, _round_down((vmem_limit // 4) // (3 * 4 * hidden), gran))
    chunk = max(gran, _round_down(min(256, chunk_cap, rows_r), gran))
    if rows_r <= chunk:
        chunk = rows_r  # single (possibly ragged) chunk covers everything

    # Block budget: VMEM limit minus strip-mined fp32 temporaries, resident
    # gamma/beta, and slack. x + out blocks are double-buffered
    # -> 4 * hidden * itemsize bytes per tile row.
    fixed = 3 * chunk * hidden * 4 + 4 * hidden * 4 + (1 << 20)
    per_row = 4 * hidden * itemsize
    block_budget = max(per_row * chunk, int(vmem_limit * 0.8) - fixed)
    max_tile = max(chunk, _round_down(block_budget // per_row, chunk))
    max_tile = min(max_tile, 8192)  # keep enough grid steps for pipelining

    # Ensure several grid steps when rows permit: >= 2 needed to use both
    # v7x TensorCores on the "parallel" axis; ~8 smooths the DMA pipeline.
    target_steps = 8
    max_steps = pl.cdiv(rows_r, chunk)
    num_tiles = min(max(pl.cdiv(rows, max_tile), target_steps), max_steps)
    tile_rows = _round_up(pl.cdiv(rows, num_tiles), chunk)
    tile_rows = min(tile_rows, max_tile)
    return tile_rows, chunk


def bert_layer_norm(x, weight, bias, eps=1e-12, tile_rows=None, chunk_rows=None):
    """x: (..., hidden); weight/bias: (hidden,). Returns same shape/dtype as x."""
    orig_shape = x.shape
    hidden = orig_shape[-1]
    rows = 1
    for d in orig_shape[:-1]:
        rows *= d

    itemsize = jnp.dtype(x.dtype).itemsize
    gran = _sublane_granularity(itemsize)

    vmem_cap = _vmem_capacity_bytes()
    # 48 MiB on v7x (64 MiB physical), 96 MiB on v5e/v6e (128 MiB physical).
    vmem_limit = min(int(vmem_cap * 3 // 4), 96 * 1024 * 1024)

    if tile_rows is None or chunk_rows is None:
        auto_tile, auto_chunk = _pick_tiling(rows, hidden, itemsize, vmem_limit)
        if chunk_rows is None:
            chunk_rows = auto_chunk
        if tile_rows is None:
            tile_rows = auto_tile
    # Normalize user-provided overrides: chunk multiple of sublane granularity,
    # tile multiple of chunk.
    chunk_rows = max(gran, _round_down(chunk_rows, gran))
    tile_rows = max(chunk_rows, _round_up(tile_rows, chunk_rows))
    n_chunks = tile_rows // chunk_rows

    x2 = x.reshape(rows, hidden)
    w2 = weight.reshape(1, hidden)
    b2 = bias.reshape(1, hidden)

    num_tiles = pl.cdiv(rows, tile_rows)  # ragged last block handled in-kernel

    kernel = functools.partial(
        _layernorm_kernel, eps=eps, chunk=chunk_rows, n_chunks=n_chunks
    )

    cost = pl.CostEstimate(
        flops=8 * rows * hidden,
        transcendentals=rows,
        bytes_accessed=2 * rows * hidden * itemsize
        + 2 * hidden * jnp.dtype(weight.dtype).itemsize,
    )

    out = pl.pallas_call(
        kernel,
        out_shape=jax.ShapeDtypeStruct((rows, hidden), x.dtype),
        grid_spec=pl.GridSpec(
            grid=(num_tiles,),
            in_specs=[
                pl.BlockSpec((tile_rows, hidden), lambda i: (i, 0)),
                # Constant block index -> gamma/beta stay resident in VMEM
                # across grid steps (no per-step DMA).
                pl.BlockSpec((1, hidden), lambda i: (0, 0)),
                pl.BlockSpec((1, hidden), lambda i: (0, 0)),
            ],
            out_specs=pl.BlockSpec((tile_rows, hidden), lambda i: (i, 0)),
        ),
        compiler_params=pltpu.CompilerParams(
            dimension_semantics=("parallel",),
            vmem_limit_bytes=vmem_limit,
        ),
        cost_estimate=cost,
    )(x2, w2, b2)

    return out.reshape(orig_shape)


def _ref_layernorm(x, weight, bias, eps):
    u = jnp.mean(x, axis=-1, keepdims=True)
    s = jnp.mean((x - u) ** 2, axis=-1, keepdims=True)
    return weight * ((x - u) / jnp.sqrt(s + eps)) + bias


if __name__ == "__main__":
    # Module __init__(hidden_size): weight = ones(hidden), bias = zeros(hidden).
    batch, seq, hidden = 2, 8, 32
    key = jax.random.PRNGKey(0)
    x = jax.random.normal(key, (batch, seq, hidden), dtype=jnp.float32)
    weight = jnp.ones((hidden,), dtype=jnp.float32)
    bias = jnp.zeros((hidden,), dtype=jnp.float32)

    y = bert_layer_norm(x, weight, bias, eps=1e-12)
    jax.block_until_ready(y)
    ref = _ref_layernorm(x, weight, bias, 1e-12)
    assert jnp.allclose(y, ref, atol=1e-5, rtol=1e-5), "mismatch vs reference"

    # Non-divisible row count (111 rows): exercises the ragged last block
    # (masked OOB writeback), now with no wrapper pad/slice.
    x2 = jax.random.normal(jax.random.PRNGKey(1), (3, 37, 256), dtype=jnp.float32)
    w2 = jax.random.normal(jax.random.PRNGKey(2), (256,), dtype=jnp.float32)
    b2 = jax.random.normal(jax.random.PRNGKey(3), (256,), dtype=jnp.float32)
    y2 = bert_layer_norm(x2, w2, b2, eps=1e-12)
    jax.block_until_ready(y2)
    ref2 = _ref_layernorm(x2, w2, b2, 1e-12)
    assert jnp.allclose(y2, ref2, atol=1e-5, rtol=1e-5), "mismatch (ragged rows)"

    # Force small tile/chunk overrides to exercise the strip-mined fori_loop
    # body (n_chunks > 1) plus a multi-step grid with a ragged last tile.
    x3 = jax.random.normal(jax.random.PRNGKey(4), (4, 150, 128), dtype=jnp.float32)
    w3 = jax.random.normal(jax.random.PRNGKey(5), (128,), dtype=jnp.float32)
    b3 = jax.random.normal(jax.random.PRNGKey(6), (128,), dtype=jnp.float32)
    y3 = bert_layer_norm(x3, w3, b3, eps=1e-12, tile_rows=256, chunk_rows=64)
    jax.block_until_ready(y3)
    ref3 = _ref_layernorm(x3, w3, b3, 1e-12)
    assert jnp.allclose(y3, ref3, atol=1e-5, rtol=1e-5), "mismatch (strip-mined)"

    print("KERNEL_OK")
</pallas_src>

<mosaic_0001>
module attributes {stable_mosaic.version = 11 : i64} {
  func.func @_layernorm_kernel(%arg0: i32, %arg1: memref<16x32xf32, #tpu.memory_space<vmem>>, %arg2: memref<1x32xf32, #tpu.memory_space<vmem>>, %arg3: memref<1x32xf32, #tpu.memory_space<vmem>>, %arg4: memref<16x32xf32, #tpu.memory_space<vmem>>) attributes {dimension_semantics = [#tpu.dimension_semantics<parallel>], iteration_bounds = array<i64: 1>, scalar_prefetch = 0 : i64, scratch_operands = 0 : i64, tpu.core_type = #tpu.core_type<tc>, window_params = [{transform_indices = @transform_0, window_bounds = array<i64: 16, 32>}, {pipeline_mode = #tpu.pipeline_mode<synchronous>, transform_indices = @transform_1, window_bounds = array<i64: 1, 32>}, {pipeline_mode = #tpu.pipeline_mode<synchronous>, transform_indices = @transform_2, window_bounds = array<i64: 1, 32>}, {transform_indices = @transform_3, window_bounds = array<i64: 16, 32>}]} {
    %c0 = arith.constant 0 : index
    %c0_0 = arith.constant 0 : index
    %0 = vector.load %arg2[%c0, %c0_0] : memref<1x32xf32, #tpu.memory_space<vmem>>, vector<1x32xf32>
    %c0_1 = arith.constant 0 : index
    %c0_2 = arith.constant 0 : index
    %1 = vector.load %arg3[%c0_1, %c0_2] : memref<1x32xf32, #tpu.memory_space<vmem>>, vector<1x32xf32>
    %c0_i32 = arith.constant 0 : i32
    %2 = tpu.assume_multiple %c0_i32, 16 : i32
    %3 = arith.index_cast %2 : i32 to index
    %c0_3 = arith.constant 0 : index
    %4 = vector.load %arg1[%3, %c0_3] : memref<16x32xf32, #tpu.memory_space<vmem>>, vector<16x32xf32>
    %cst = arith.constant dense<0.000000e+00> : vector<16xf32>
    %5 = vector.multi_reduction <add>, %4, %cst [1] : vector<16x32xf32> to vector<16xf32>
    %6 = vector.shape_cast %5 : vector<16xf32> to vector<16x1xf32>
    %cst_4 = arith.constant 3.200000e+01 : f32
    %7 = vector.broadcast %cst_4 : f32 to vector<16x1xf32>
    %8 = arith.divf %6, %7 : vector<16x1xf32>
    %9 = vector.broadcast %8 : vector<16x1xf32> to vector<16x32xf32>
    %10 = arith.subf %4, %9 : vector<16x32xf32>
    %11 = arith.mulf %10, %10 : vector<16x32xf32>
    %cst_5 = arith.constant dense<0.000000e+00> : vector<16xf32>
    %12 = vector.multi_reduction <add>, %11, %cst_5 [1] : vector<16x32xf32> to vector<16xf32>
    %13 = vector.shape_cast %12 : vector<16xf32> to vector<16x1xf32>
    %cst_6 = arith.constant 3.200000e+01 : f32
    %14 = vector.broadcast %cst_6 : f32 to vector<16x1xf32>
    %15 = arith.divf %13, %14 : vector<16x1xf32>
    %cst_7 = arith.constant 9.99999996E-13 : f32
    %16 = vector.broadcast %cst_7 : f32 to vector<16x1xf32>
    %17 = arith.addf %15, %16 : vector<16x1xf32>
    %18 = math.rsqrt %17 : vector<16x1xf32>
    %19 = vector.broadcast %18 : vector<16x1xf32> to vector<16x32xf32>
    %20 = arith.mulf %10, %19 : vector<16x32xf32>
    %21 = vector.broadcast %0 : vector<1x32xf32> to vector<16x32xf32>
    %22 = arith.mulf %21, %20 : vector<16x32xf32>
    %23 = vector.broadcast %1 : vector<1x32xf32> to vector<16x32xf32>
    %24 = arith.addf %22, %23 : vector<16x32xf32>
    %25 = arith.index_cast %2 : i32 to index
    %c0_8 = arith.constant 0 : index
    %26 = vector.load %arg4[%25, %c0_8] : memref<16x32xf32, #tpu.memory_space<vmem>>, vector<16x32xf32>
    tpu.vector_store %arg4[%25, %c0_8], %24 {strides = array<i32>} : memref<16x32xf32, #tpu.memory_space<vmem>>, vector<16x32xf32>,
    return
  }
  func.func @transform_0(%arg0: i32) -> (i32, i32) {
    %c0_i32 = arith.constant 0 : i32
    %c0_i32_0 = arith.constant 0 : i32
    return %arg0, %c0_i32 : i32, i32
  }
  func.func @transform_1(%arg0: i32) -> (i32, i32) {
    %c0_i32 = arith.constant 0 : i32
    %c0_i32_0 = arith.constant 0 : i32
    %c0_i32_1 = arith.constant 0 : i32
    return %c0_i32, %c0_i32_0 : i32, i32
  }
  func.func @transform_2(%arg0: i32) -> (i32, i32) {
    %c0_i32 = arith.constant 0 : i32
    %c0_i32_0 = arith.constant 0 : i32
    %c0_i32_1 = arith.constant 0 : i32
    return %c0_i32, %c0_i32_0 : i32, i32
  }
  func.func @transform_3(%arg0: i32) -> (i32, i32) {
    %c0_i32 = arith.constant 0 : i32
    %c0_i32_0 = arith.constant 0 : i32
    return %arg0, %c0_i32 : i32, i32
  }
}

</mosaic_0001>

<bundles_post_ra>
// kernel: tpu_custom_call.1
= control target key start
LH: loop header
LB: loop body
LE: loop exit
PB: predicated region body
PF: predicated region fallthrough
CT: control target
= control target key end

     0   :  { %8 = vsyncpa [#allocation3], 0  ;;  %s220_s0 = inlined_call_operand.hbm [shape: f32[16,32], index: 0, kind: input, shape index: {}]   ;;  %s221_s1 = inlined_call_operand.vmem [shape: f32[1,32], index: 1, kind: input, shape index: {}]   ;;  %s222_s2 = inlined_call_operand.vmem [shape: f32[1,32], index: 2, kind: input, shape index: {}]   ;;  %s223_s3 = inlined_call_operand.hbm [shape: f32[16,32], index: 3, kind: output, shape index: {}]  }
   0x1   :  { %9 = vsyncpa [#allocation4], 0  ;;  %s154_s12 = smov [#allocation2]   ;;  %s106_s16 = scalar_lea.hbm %s220_s0, 256 }
   0x2   :  { %s15_s13 = sshll.u32 %s154_s12, 4  ;;  %p107_p0 = scmp.ne.s32.totalorder %s220_s0, %s106_s16  ;;  %s16_s13 = int_to_ptr.vmem [resolvable:$true] %s15_s13 }
   0x3   :  { %p110_p1 = scmp.lt.u32.totalorder %s106_s16, %s220_s0 }
   0x5   :  { %p112_p2 = pnand %p110_p1, %p107_p0 }
   0x7   :  { %115 = shalt.err (!%p112_p2)
}
   0x8   :  { %s116_s21 = scalar_lea.vmem %s16_s13, 256  ;;  %p121_p4 = scmp.lt.s32.totalorder %s16_s13, %s16_s13 }
   0x9   :  { %p117_p3 = scmp.ne.s32.totalorder %s16_s13, %s116_s21  ;;  %p122_p5 = scmp.lt.s32.totalorder %s116_s21, %s116_s21 }
   0xb   :  { %p123_p6 = por %p122_p5, %p121_p4 }
   0xd   :  { %p124_p7 = pnand %p123_p6, %p117_p3 }
   0xf   :  { %127 = shalt.err (!%p124_p7)
}
  0x10   :  { %s155_s22 = smov 128   ;;  %s156_s23 = smov 8  }
  0x11   :  { %21 = dma.hbm_to_vmem [thread:$0]  %s220_s0, 256, %s16_s13, [#allocation3], %s155_s22, %s155_s22, %s156_s23  }
  0x12   :  { %150 = dma.done.wait [#allocation3], 256  }
  0x13   :  { %151 = vsyncadd [#allocation3], 4294967040  ;;  %vm33_vm0 = vcmask 261120   ;;  %v31_v0 = vld [vmem:[#allocation2] sm:$0xff]  ;;  %v32_v1 = vld [vmem:[#allocation2 + $0x8] sm:$0xff]  ;;  %s157_s29 = smov [#allocation5]  }
  0x14   :  { %v34_v2 = vsel %vm33_vm0, %v31_v0, 0.0  ;;  %v37_v3 = vsel %vm33_vm0, %v32_v1, 0.0  ;;  %v96_v21 = vld [vmem:[%s221_s1] ss:$0 sm:$0xff]  ;;  %s84_s30 = sshll.u32 %s157_s29, 4  ;;  %s85_s30 = int_to_ptr.vmem [resolvable:$true] %s84_s30 }
  0x15   :  { %35 = vadd.xlane.f32.xlu0 %v34_v2  ;;  %v97_v23 = vld [vmem:[%s222_s2] ss:$0 sm:$0xff]  ;;  %s128_s4 = scalar_lea.vmem %s85_s30, 256  ;;  %p133_p9 = scmp.lt.s32.totalorder %s85_s30, %s85_s30 }
  0x16   :  { %p129_p8 = scmp.ne.s32.totalorder %s85_s30, %s128_s4  ;;  %p134_p10 = scmp.lt.s32.totalorder %s128_s4, %s128_s4 }
  0x18   :  { %p135_p11 = por %p134_p10, %p133_p9 }
  0x19   :  { %38 = vadd.xlane.f32.xlu0 %v37_v3 }
  0x1a   :  { %p136_p12 = pnand %p135_p11, %p129_p8 }
  0xa2   :  { %v36_v4 = vpop.xlane.xlu0 %35 }
  0xa3   :  { %v41_v5 = vmul.f32 0.03125, %v36_v4 }
  0xa5   :  { %v43_v6 = vsub.f32 %v31_v0, %v41_v5 }
  0xa6   :  { %v39_v7 = vpop.xlane.xlu0 %38 }
  0xa7   :  { %v42_v8 = vmul.f32 0.03125, %v39_v7  ;;  %v45_v9 = vmul.f32 %v43_v6, %v43_v6 }
  0xa9   :  { %v44_v10 = vsub.f32 %v32_v1, %v42_v8  ;;  %v47_v11 = vsel %vm33_vm0, %v45_v9, 0.0 }
  0xaa   :  { %48 = vadd.xlane.f32.xlu1 %v47_v11 }
  0xab   :  { %v46_v12 = vmul.f32 %v44_v10, %v44_v10 }
  0xad   :  { %v50_v13 = vsel %vm33_vm0, %v46_v12, 0.0 }
  0xae   :  { %51 = vadd.xlane.f32.xlu1 %v50_v13 }
 0x137   :  { %v49_v14 = vpop.xlane.xlu1 %48 }
 0x138   :  { %v53_v15 = vmul.f32 0.03125, %v49_v14 }
 0x13a   :  { %v55_v16 = vadd.f32 1e-12, %v53_v15 }
 0x13b   :  { %v52_v17 = vpop.xlane.xlu1 %51 }
 0x13c   :  { %102 = vrsqrt.f32 %v55_v16  ;;  %v54_v18 = vmul.f32 0.03125, %v52_v17 }
 0x13e   :  { %v56_v19 = vadd.f32 1e-12, %v54_v18 }
 0x140   :  { %104 = vrsqrt.f32 %v56_v19 }
 0x146   :  { %v103_v20 = vpop.eup %102 }
 0x147   :  { %v59_v22 = vmul.f32 %v103_v20, %v43_v6 }
 0x149   :  { %v67_v24 = vmul.f32 %v96_v21, %v59_v22 }
 0x14a   :  { %v105_v25 = vpop.eup %104 }
 0x14b   :  { %v60_v26 = vmul.f32 %v105_v25, %v44_v10  ;;  %v75_v27 = vadd.f32 %v97_v23, %v67_v24 }
 0x14d   :  { %v68_v28 = vmul.f32 %v96_v21, %v60_v26  ;;  %77 = vst.msk [vmem:[#allocation5] sm:$0xff] %vm33_vm0, %v75_v27 }
 0x14f   :  { %v76_v29 = vadd.f32 %v97_v23, %v68_v28 }
 0x151   :  { %78 = vst.msk [vmem:[#allocation5 + $0x8] sm:$0xff] %vm33_vm0, %v76_v29 }
 0x152   :  { %139 = shalt.err (!%p136_p12)
}
 0x153   :  { %s140_s5 = scalar_lea.hbm %s223_s3, 256 }
 0x154   :  { %p141_p13 = scmp.ne.s32.totalorder %s223_s3, %s140_s5  ;;  %p144_p0 = scmp.lt.u32.totalorder %s140_s5, %s223_s3 }
 0x156   :  { %p146_p1 = pnand %p144_p0, %p141_p13 }
 0x158   :  { %149 = shalt.err (!%p146_p1)
}
 0x159   :  { %90 = dma.vmem_to_hbm [thread:$0]  %s85_s30, 256, %s223_s3, [#allocation4], %s155_s22, %s155_s22, %s156_s23  }
 0x15a   :  { %152 = dma.done.wait [#allocation4], 256  }
 0x15b   :  { %153 = vsyncadd [#allocation4], 4294967040 }
 0x15c   :  { %94 = vsyncpa [#allocation3], 1 }
 0x15d   :  { %95 = vsyncpa [#allocation4], 1 }

</bundles_post_ra>
